<compile_context>
chip_gen: v7x
topology: tpu7x:2x2x1
jax: 0.10.0
libtpu: 0.0.40
codegen_flags: <defaults>
</compile_context>

<pallas_src>
import functools
import math

import jax
import jax.numpy as jnp
from jax.experimental import pallas as pl
from jax.experimental.pallas import tpu as pltpu


# ---------------------------------------------------------------------------
# Kernel body
# ---------------------------------------------------------------------------
def _pe_add_kernel(x_ref, pe_ref, o_ref, *, batch_tile: int):
    # x_ref / o_ref : (ts, batch_tile * d_model) lane-dense tiles
    # pe_ref        : (ts, d_model) tile of the persistent pe buffer
    pe = pe_ref[...]
    if batch_tile > 1:
        # Flattened x rows are [b0:d0..dD-1 | b1:d0..dD-1 | ...]; repeat pe
        # along the lane axis so it lines up with every batch copy in the row.
        pe = jnp.tile(pe, (1, batch_tile))
    o_ref[...] = x_ref[...] + pe
    # eval-mode dropout -> identity (no masking / scaling)


# ---------------------------------------------------------------------------
# Persistent PE buffer (matches the torch register_buffer, squeezed to 2D)
# ---------------------------------------------------------------------------
def make_pe_buffer(d_model: int, max_len: int = 1000, dtype=jnp.float32):
    """Deterministic sinusoidal PE buffer, [max_len, d_model]."""
    position = jnp.arange(max_len, dtype=jnp.float32)[:, None]            # (L, 1)
    div_term = jnp.exp(
        jnp.arange(0, d_model, 2, dtype=jnp.float32)
        * (-math.log(10000.0) / d_model)
    )                                                                      # (ceil(D/2),)
    args = position * div_term                                             # (L, ceil(D/2))
    pe = jnp.zeros((max_len, d_model), dtype=jnp.float32)
    pe = pe.at[:, 0::2].set(jnp.sin(args))
    # Slice cos args so odd d_model doesn't break (same math as torch for even D).
    pe = pe.at[:, 1::2].set(jnp.cos(args)[:, : d_model // 2])
    return pe.astype(dtype)


# ---------------------------------------------------------------------------
# Tile-selection policy (generation / dtype aware)
# ---------------------------------------------------------------------------
def _sublane_quantum(itemsize: int) -> int:
    """Rows per packed vreg sublane group: f32->8, bf16->16, int8/fp8->32."""
    return {4: 8, 2: 16, 1: 32}.get(itemsize, 8)


def _round_up(x: int, m: int) -> int:
    return ((x + m - 1) // m) * m


def _vmem_limit_bytes() -> int:
    """Generation-aware scoped-VMEM limit (v5e/v6e: 128 MiB phys, v7x: 64 MiB)."""
    try:
        phys = int(pltpu.get_tpu_info().vmem_capacity_bytes)
    except Exception:
        phys = 64 << 20            # conservative fallback (v7x per-core figure)
    return max(32 << 20, min((phys * 3) // 4, 96 << 20))


def _choose_tiles(seq_len: int, batch: int, d_model: int, itemsize: int,
                  usable_bytes: int) -> tuple[int, int]:
    """Return (seq_tile, batch_tile) for the 2D grid."""
    q = _sublane_quantum(itemsize)

    def footprint(ts, bt):
        lane = bt * d_model
        # double-buffered x-in + out + pe tiles
        return 2 * ts * itemsize * (2 * lane + d_model)

    # ---- lane (batch) tiling: only when even a minimum-height tile with the
    # full row would blow VMEM, and only in 128-lane-aligned chunks so the
    # BlockSpec lane rule and the jnp.tile alignment both hold.
    batch_tile = batch
    if footprint(q, batch) > usable_bytes:
        for cand in range(batch - 1, 0, -1):
            if batch % cand:
                continue
            if (cand * d_model) % 128:
                continue
            if footprint(q, cand) <= usable_bytes:
                batch_tile = cand
                break
        # If no aligned divisor fits we keep the full row; ts=q is then the
        # best we can do for this layout.

    # ---- seq tiling: biggest tile that (a) fits VMEM double-buffered and
    # (b) still yields >=~4 grid steps for pipelining / 2-TC sharding on v7x.
    per_row = 2 * itemsize * (2 * batch_tile * d_model + d_model)
    ts_vmem = max(q, ((usable_bytes // per_row) // q) * q)
    ts_grid = _round_up(pl.cdiv(seq_len, 4), q)
    ts = min(ts_vmem, ts_grid)

    if ts >= seq_len:
        return seq_len, batch_tile

    ts = max(q, (ts // q) * q)
    # Prefer a quantum-aligned divisor of seq_len (unmasked stores, full DMAs).
    t = ts
    while t >= q:
        if seq_len % t == 0:
            return t, batch_tile
        t -= q
    return ts, batch_tile            # ragged last tile; Pallas masks it


# ---------------------------------------------------------------------------
# Wrapper
# ---------------------------------------------------------------------------
def positional_encoding_forward(x: jax.Array, pe: jax.Array, *,
                                tile_seq: int | None = None,
                                tile_batch: int | None = None,
                                donate_x: bool = False) -> jax.Array:
    """x: [seq_len, batch, d_model]; pe: [max_len, d_model] persistent buffer."""
    seq_len, batch, d_model = x.shape
    max_len = pe.shape[0]
    assert pe.shape == (max_len, d_model) and seq_len <= max_len

    # Callers should cache pe in x.dtype (the demo does); cast only as fallback.
    if pe.dtype != x.dtype:
        pe = pe.astype(x.dtype)

    # Lane-dense 2D view of x (free reshape of a contiguous array).
    x2 = x.reshape(seq_len, batch * d_model)
    itemsize = x2.dtype.itemsize

    vmem_limit = _vmem_limit_bytes()
    usable = int(vmem_limit * 0.6)          # leave headroom for pipeline state

    ts_auto, bt_auto = _choose_tiles(seq_len, batch, d_model, itemsize, usable)

    ts = min(tile_seq, seq_len) if tile_seq is not None else ts_auto
    if ts < seq_len:
        ts = max(8, (ts // 8) * 8)          # hard sublane-alignment constraint
    bt = tile_batch if tile_batch is not None else bt_auto
    assert batch % bt == 0, "tile_batch must divide batch"
    lane_tile = bt * d_model
    if bt != batch:
        assert lane_tile % 128 == 0, (
            "lane tiling requires batch_tile * d_model to be a multiple of 128")

    # pe BlockSpec sublane rule: block rows must be a multiple of 8 or equal
    # pe's full first dim.  Pre-slice only in the tiny non-aligned edge case.
    pe_in = pe
    if ts == seq_len and (seq_len % 8 != 0) and seq_len != max_len:
        pe_in = pe[:seq_len]

    grid = (pl.cdiv(seq_len, ts), batch // bt)
    kernel = functools.partial(_pe_add_kernel, batch_tile=bt)

    # Aliasing only pays off when x is actually donated; otherwise XLA would
    # insert a defensive copy (extra HBM read+write of the activation).
    alias = {0: 0} if donate_x else {}

    out2 = pl.pallas_call(
        kernel,
        out_shape=jax.ShapeDtypeStruct((seq_len, batch * d_model), x.dtype),
        grid_spec=pltpu.PrefetchScalarGridSpec(
            num_scalar_prefetch=0,
            grid=grid,
            in_specs=[
                pl.BlockSpec((ts, lane_tile), lambda i, j: (i, j)),   # x
                pl.BlockSpec((ts, d_model), lambda i, j: (i, 0)),     # pe
            ],
            out_specs=pl.BlockSpec((ts, lane_tile), lambda i, j: (i, j)),
        ),
        compiler_params=pltpu.CompilerParams(
            dimension_semantics=("parallel", "parallel"),
            vmem_limit_bytes=vmem_limit,
        ),
        input_output_aliases=alias,
    )(x2, pe_in)

    return out2.reshape(seq_len, batch, d_model)


# ---------------------------------------------------------------------------
# Demo / self-check
# ---------------------------------------------------------------------------
if __name__ == "__main__":
    max_len = 1000
    key = jax.random.PRNGKey(0)
    k1, k2 = jax.random.split(key)

    # --- f32 case (module-scale shapes): auto tiler -> ts=16, grid=(4, 1)
    seq_len, batch, d_model = 64, 2, 32
    x = jax.random.normal(k1, (seq_len, batch, d_model), dtype=jnp.float32)
    pe = make_pe_buffer(d_model, max_len=max_len, dtype=jnp.float32)
    ref = x + pe[:seq_len][:, None, :]

    out = jax.block_until_ready(positional_encoding_forward(x, pe))
    assert out.shape == (seq_len, batch, d_model)
    assert jnp.allclose(out, ref, atol=1e-6, rtol=1e-6)

    # --- bf16 case (sublane quantum 16): auto tiler -> ts=32, grid=(3, 1)
    seq_len2, batch2, d_model2 = 96, 4, 128
    xb = jax.random.normal(k2, (seq_len2, batch2, d_model2), dtype=jnp.bfloat16)
    pe2 = make_pe_buffer(d_model2, max_len=max_len, dtype=jnp.bfloat16)
    ref2 = xb + pe2[:seq_len2][:, None, :]

    out_bf16 = jax.block_until_ready(positional_encoding_forward(xb, pe2))
    assert jnp.allclose(out_bf16.astype(jnp.float32),
                        ref2.astype(jnp.float32), atol=1e-2, rtol=1e-2)

    # --- explicit lane-tiling path (128-lane-aligned): grid=(3, 4)
    out_lane = jax.block_until_ready(
        positional_encoding_forward(xb, pe2, tile_seq=32, tile_batch=1))
    assert jnp.allclose(out_lane.astype(jnp.float32),
                        ref2.astype(jnp.float32), atol=1e-2, rtol=1e-2)

    print("KERNEL_OK")
</pallas_src>

<mosaic_0001>
module attributes {stable_mosaic.version = 11 : i64} {
  func.func @_pe_add_kernel(%arg0: i32, %arg1: i32, %arg2: memref<16x64xf32, #tpu.memory_space<vmem>>, %arg3: memref<16x32xf32, #tpu.memory_space<vmem>>, %arg4: memref<16x64xf32, #tpu.memory_space<vmem>>) attributes {dimension_semantics = [#tpu.dimension_semantics<parallel>, #tpu.dimension_semantics<parallel>], iteration_bounds = array<i64: 4, 1>, scalar_prefetch = 0 : i64, scratch_operands = 0 : i64, tpu.core_type = #tpu.core_type<tc>, window_params = [{transform_indices = @transform_0, window_bounds = array<i64: 16, 64>}, {transform_indices = @transform_1, window_bounds = array<i64: 16, 32>}, {transform_indices = @transform_2, window_bounds = array<i64: 16, 64>}]} {
    %c0 = arith.constant 0 : index
    %c0_0 = arith.constant 0 : index
    %0 = vector.load %arg3[%c0, %c0_0] : memref<16x32xf32, #tpu.memory_space<vmem>>, vector<16x32xf32>
    %1 = tpu.concatenate %0, %0 in 1 : vector<16x32xf32>, vector<16x32xf32> -> vector<16x64xf32>
    %c0_1 = arith.constant 0 : index
    %c0_2 = arith.constant 0 : index
    %2 = vector.load %arg2[%c0_1, %c0_2] : memref<16x64xf32, #tpu.memory_space<vmem>>, vector<16x64xf32>
    %3 = arith.addf %2, %1 : vector<16x64xf32>
    %c0_3 = arith.constant 0 : index
    %c0_4 = arith.constant 0 : index
    %4 = vector.load %arg4[%c0_3, %c0_4] : memref<16x64xf32, #tpu.memory_space<vmem>>, vector<16x64xf32>
    tpu.vector_store %arg4[%c0_3, %c0_4], %3 {strides = array<i32>} : memref<16x64xf32, #tpu.memory_space<vmem>>, vector<16x64xf32>,
    return
  }
  func.func @transform_0(%arg0: i32, %arg1: i32) -> (i32, i32) {
    %c0_i32 = arith.constant 0 : i32
    return %arg0, %arg1 : i32, i32
  }
  func.func @transform_1(%arg0: i32, %arg1: i32) -> (i32, i32) {
    %c0_i32 = arith.constant 0 : i32
    %c0_i32_0 = arith.constant 0 : i32
    return %arg0, %c0_i32 : i32, i32
  }
  func.func @transform_2(%arg0: i32, %arg1: i32) -> (i32, i32) {
    %c0_i32 = arith.constant 0 : i32
    return %arg0, %arg1 : i32, i32
  }
}

</mosaic_0001>

<bundles_post_ra>
// kernel: tpu_custom_call.1
= control target key start
LH: loop header
LB: loop body
LE: loop exit
PB: predicated region body
PF: predicated region fallthrough
CT: control target
= control target key end

     0   :  { %7 = vsyncpa [#allocation3], 0  ;;  %s624_s0 = inlined_call_operand.vmem [shape: f32[64,64], index: 0, kind: input, shape index: {}]   ;;  %s625_s1 = inlined_call_operand.vmem [shape: f32[1000,32], index: 1, kind: input, shape index: {}]   ;;  %s626_s2 = inlined_call_operand.hbm [shape: f32[64,64], index: 2, kind: output, shape index: {}]  }
   0x1   :  { %9 = vsyncpa [#allocation3 + $0x1], 0  ;;  %s507_s9 = smov 0   ;;  %s509_s10 = smov 0  }
   0x2   :  { %s511_s11 = smov 0   ;;  %s513_s12 = smov 0  }
   0x3   :  { %s515_s13 = smov 0   ;;  %s517_s14 = smov 0  }
   0x4 LB: > { %s334_s15 = sadd.s32 4294967295, %s486_s14   ;;  %s335_s16 = sadd.s32 4294967294, %s486_s14   ;;  %s486_s14 = sphi %s517_s14, %s15_s14   ;;  %s482_s13 = sphi %s515_s13, %s633_s13   ;;  %s478_s12 = sphi %s513_s12, %s632_s12   ;;  %s474_s11 = sphi %s511_s11, %s631_s11   ;;  %s470_s10 = sphi %s509_s10, %s630_s10   ;;  %s466_s9 = sphi %s507_s9, %s629_s9  }
   0x5   : > { %s27_s17 = sadd.s32 1, %s482_s13  ;;  %s90_s18 = sadd.s32 1, %s474_s11 }
   0x6   : > { %p29_p0 = scmp.ge.s32.totalorder %s27_s17, 4  ;;  %p100_p1 = scmp.ne.s32.totalorder %s474_s11, %s470_s10 }
   0x7   : > { %p101_p2 = scmp.eq.s32.totalorder %s334_s15, 3  ;;  %p106_p3 = scmp.ne.s32.totalorder %s470_s10, %s466_s9 }
   0x8   : > { %s635_s17 = smov (%p29_p0, %s27_s17), 0  ;;  %p107_p5 = scmp.eq.s32.totalorder %s335_s16, 3 }
   0x9   : > { %p547_p4 = por %p101_p2, %p100_p1  ;;  %s85_s20 = ssub.s32 %s482_s13, %s635_s17 }
   0xa   : > { %p338_p6 = scmp.ge.s32.totalorder %s486_s14, 1  ;;  %p88_p7 = scmp.eq.s32.totalorder %s85_s20, 0 }
   0xb   : > { %p554_p8 = por %p107_p5, %p106_p3  ;;  %p154_p9 = scmp.lt.s32.totalorder %s486_s14, 5 }
   0xc   : > { %s560_s22 = scalar_select %p88_p7, %s474_s11, %s90_s18  }
   0xd   : > { %p155_p10 = pnand %p338_p6, %p154_p9 }
   0xe   : > { %s340_s23 = sshll.u32 (!%p155_p10), %s478_s12, 1  ;;  %s488_s29 = smov (!%p155_p10), 32   ;;  %vm222_vm0 = vcmask (!%p155_p10), 261120   ;;  %vm229_vm1 = vcmask (!%p155_p10), 523264  }
   0xf   : > { %158 = sbr.rel (%p155_p10) target bundleno = 164 (0xa4), region = 28  ;;  %p202_p11 = scmp.lt.s32.totalorder (!%p155_p10), %s340_s23, 124 }
  0x10   : > { %p189_p12 = scmp.lt.s32.totalorder (!%p155_p10), %s340_s23, 7  ;;  %s185_s3 = sand.u32 (!%p155_p10), 1, %s470_s10  }
  0x11   : > { %s339_s7 = sshll.u32 (!%p155_p10), %s185_s3, 4  ;;  %s349_s16 = sshll.u32 (!%p155_p10), %s478_s12, 8 }
  0x12   : > { %s187_s8 = scalar_lea.vmem (!%p155_p10), [#allocation2], %s339_s7  ;;  %s489_s12 = smov (!%p155_p10), [#allocation2]  }
  0x13   : > { %s247_s15 = sshll.u32 (!%p155_p10), %s187_s8, 4  ;;  %s412_s26 = sshll.u32 (!%p155_p10), %s489_s12, 4  ;;  %s576_s15 = int_to_ptr.vmem [resolvable:$true] %s247_s15  ;;  %s413_s26 = int_to_ptr.vmem [resolvable:$false] %s412_s26 }
  0x14   : > { %s414_s27 = scalar_lea.vmem (!%p155_p10), %s413_s26, 512  ;;  %p415_p2 = scmp.lt.s32.totalorder (!%p155_p10), %s576_s15, %s413_s26 }
  0x16   : > { %s203_s24 = scalar_select %p202_p11, %s340_s23, 124 }
  0x17   : > { %s637_s23 = smov (!%p189_p12, %s340_s23), 7 }
  0x18   : > { %s343_s25 = sshll.u32 %s203_s24, 3  ;;  %s341_s30 = sshll.u32 %s637_s23, 3 }
  0x19   : > { %s205_s28 = scalar_lea.vmem %s625_s1, %s343_s25  ;;  %s195_s6 = scalar_lea.vmem %s624_s0, %s341_s30 }
  0x1a   : > { %v212_v0 = vld [vmem:[%s205_s28] sm:$0xff]  ;;  %v213_v1 = vld [vmem:[%s205_s28 + $0x8] sm:$0xff]  ;;  %s574_s23 = scalar_lea.hbm %s626_s2, %s349_s16  ;;  %s578_s24 = scalar_lea.sflag [#allocation3], %s185_s3 }
  0x1b   : > { %216 = vrot.lane.b32.xlu0 %v212_v0, %s488_s29  ;;  %v225_v2 = vld [vmem:[%s195_s6] sm:$0xff]  ;;  %v226_v6 = vld [vmem:[%s195_s6 + $0x8] sm:$0xff]  ;;  %s408_s25 = scalar_lea.vmem %s576_s15, 256 }
  0x1c   : > { %p409_p13 = scmp.ne.s32.totalorder %s576_s15, %s408_s25  ;;  %p416_p3 = scmp.lt.s32.totalorder %s414_s27, %s408_s25 }
  0x1e   : > { %p410_p0 = pnand %p409_p13, %p547_p4  ;;  %p417_p5 = por %p416_p3, %p415_p2 }
  0x1f   : > { %218 = vrot.lane.b32.xlu0 %v213_v1, %s488_s29 }
  0x20   : > { %p411_p1 = pneg %p410_p0 }
  0x22   : > { %p418_p6 = pnand %p417_p5, %p411_p1 }
  0x8d   : > { %v217_v3 = vpop.permute.xlu0 %216 }
  0x8e   : > { %v223_v4 = vsel %vm222_vm0, %v212_v0, %v217_v3 }
  0x8f   : > { %v227_v5 = vadd.f32 %v225_v2, %v223_v4 }
  0x91   : > { %230 = vst.msk [vmem:[%s187_s8] sm:$0xff] %vm229_vm1, %v227_v5  ;;  %v219_v7 = vpop.permute.xlu0 %218 }
  0x92   : > { %v224_v8 = vsel %vm222_vm0, %v213_v1, %v219_v7 }
  0x93   : > { %v228_v9 = vadd.f32 %v226_v6, %v224_v8 }
  0x95   : > { %231 = vst.msk [vmem:[%s187_s8 + $0x8] sm:$0xff] %vm229_vm1, %v228_v9 }
  0x96   : > { %421 = shalt.err (!%p418_p6)
}
  0x97   : > { %s422_s28 = scalar_lea.hbm %s574_s23, 256  ;;  %s426_s3 = scalar_lea.hbm %s626_s2, 1024 }
  0x98   : > { %p423_p7 = scmp.ne.s32.totalorder %s574_s23, %s422_s28  ;;  %p427_p11 = scmp.lt.u32.totalorder %s574_s23, %s626_s2 }
  0x99   : > { %p428_p12 = scmp.lt.u32.totalorder %s426_s3, %s422_s28  ;;  %p430_p0 = scmp.lt.u32.totalorder %s422_s28, %s574_s23 }
  0x9a   : > { %p424_p9 = pnand %p423_p7, %p547_p4 }
  0x9b   : > { %p429_p13 = por %p428_p12, %p427_p11 }
  0x9c   : > { %p425_p10 = pneg %p424_p9 }
  0x9d   : > { %p431_p1 = por %p430_p0, %p429_p13 }
  0x9f   : > { %p432_p2 = pnand %p431_p1, %p425_p10 }
  0xa1   : > { %435 = shalt.err (!%p432_p2)
}
  0xa2   : > { %s490_s6 = smov 128   ;;  %s491_s7 = smov 8  }
  0xa3   : > { %350 = dma.vmem_to_hbm [thread:$0]  (%p547_p4), %s576_s15, 256, %s574_s23, %s578_s24, %s490_s6, %s490_s6, %s491_s7  }
  0xa4 PF: > { %p356_p3 = scmp.ge.s32.totalorder %s486_s14, 2  ;;  %s262_s8 = sand.u32 1, %s466_s9  }
  0xa5   : > { %s263_s16 = scalar_lea.sflag [#allocation3], %s262_s8 }
  0xa6   : > { %p353_p5 = pnand %p356_p3, %p554_p8 }
  0xa8   : > { %461 = dma.done.wait (!%p353_p5), %s263_s16, 256  }
  0xa9   : > { %463 = vsyncadd (!%p353_p5), %s263_s16, 4294967040  ;;  %s15_s14 = sadd.s32 1, %s486_s14   ;;  %s629_s9 = smov %s470_s10 }
  0xaa   : > { %p12_p6 = scmp.ge.s32.totalorder %s15_s14, 6   ;;  %s630_s10 = smov %s474_s11 }
  0xab   : > { %s631_s11 = smov %s560_s22  ;;  %s632_s12 = smov %s482_s13 }
  0xac   : > { %s633_s13 = smov %s635_s17  ;;  %14 = sbr.rel (!%p12_p6) target bundleno = 4 (0x4), region = 66 }
  0xb3   :  { %268 = vsyncpa [#allocation3], 1 }
  0xb4   :  { %270 = vsyncpa [#allocation3 + $0x1], 1 }

</bundles_post_ra>
